<compile_context>
chip_gen: v7x
topology: tpu7x:2x2x1
jax: 0.10.0
libtpu: 0.0.40
codegen_flags: <defaults>
</compile_context>

<pallas_src>
import functools

import jax
import jax.numpy as jnp
from jax.experimental import pallas as pl
from jax.experimental.pallas import tpu as pltpu

_LANE = 128
_SUBLANE = 8
_NEG_BIG = -1e30  # baked into padded last-layer bias lanes; exp underflows to 0


def _round_up(x, m):
    return ((x + m - 1) // m) * m


def _cdiv(a, b):
    return -(-a // b)


def _fcnet_fused_kernel(*refs, num_layers):
    """refs = (x_ref, w0, b0, w1, b1, ..., w_last, b_last, o_ref).

    Hidden layers: y = relu(x_bf16 @ W_bf16 + b)   (MXU bf16 matmul, f32 accumulate)
    Last layer   : y = x_bf16 @ W_bf16 + b         (padded class lanes carry bias=-1e30)
    Epilogue     : log_softmax over the lane-padded class dim (exact for valid classes).
    Intermediates never leave VMEM/vregs; the only HBM store is the lane-dense output tile.
    """
    x_ref = refs[0]
    o_ref = refs[-1]
    wb = refs[1:-1]

    h = x_ref[...]  # f32 (or input dtype)
    for li in range(num_layers):
        w_ref = wb[2 * li]
        b_ref = wb[2 * li + 1]
        y = jnp.dot(h.astype(w_ref.dtype), w_ref[...],
                    preferred_element_type=jnp.float32) + b_ref[...]
        if li < num_layers - 1:
            h = jnp.maximum(y, 0.0)  # ReLU for first / mediate blocks (f32 on VPU)
        else:
            h = y                    # plain Linear for last layer

    # log_softmax (f32).  Padded class lanes sit at ~-1e30 -> exp == 0, exact result.
    m = jnp.max(h, axis=-1, keepdims=True)
    shifted = h - m
    lse = jnp.log(jnp.sum(jnp.exp(shifted), axis=-1, keepdims=True))
    o_ref[...] = (shifted - lse).astype(o_ref.dtype)


def _init_linear(key, in_logical, out_logical, in_pad, out_pad, *, bias_pad_value=0.0):
    """PyTorch nn.Linear default init U(-1/sqrt(in), 1/sqrt(in)) on the logical dims,
    zero-padded to lane-dense padded dims.  Weight stored pre-transposed [in, out] in
    bf16 (MXU operand); bias stored (1, out_pad) in f32 (VPU epilogue)."""
    kw, kb = jax.random.split(key)
    bound = 1.0 / (in_logical ** 0.5)
    w = jax.random.uniform(kw, (in_logical, out_logical), jnp.float32, -bound, bound)
    b = jax.random.uniform(kb, (1, out_logical), jnp.float32, -bound, bound)
    w_pad = jnp.zeros((in_pad, out_pad), jnp.float32).at[:in_logical, :out_logical].set(w)
    b_pad = jnp.full((1, out_pad), bias_pad_value, jnp.float32).at[:, :out_logical].set(b)
    return w_pad.astype(jnp.bfloat16), b_pad


def init_fcnet_h_class_params(key, feature_channel, output_channel, hidden_list):
    num_layers = len(hidden_list) + 1
    keys = jax.random.split(key, num_layers + 2)

    in_dims = [feature_channel] + list(hidden_list)
    out_dims = list(hidden_list) + [output_channel]
    # Lane-pad every hidden width and the class dim to a multiple of 128 so intermediate
    # matmul N/K dims (and the final store) are lane-dense.  feature_channel stays
    # unpadded: padding x itself would cost an extra HBM pass in the wrapper.
    in_pads = [feature_channel] + [_round_up(h, _LANE) for h in hidden_list]
    out_pads = [_round_up(h, _LANE) for h in hidden_list] + [_round_up(output_channel, _LANE)]

    layers = []
    for li in range(num_layers):
        bias_pad = _NEG_BIG if li == num_layers - 1 else 0.0
        layers.append(_init_linear(keys[li], in_dims[li], out_dims[li],
                                   in_pads[li], out_pads[li], bias_pad_value=bias_pad))

    return {
        "layers": layers,
        "output_channel": output_channel,
        # Present in the torch module's __init__ but unused in forward(); kept for fidelity.
        "tissue_embedding": jax.random.normal(keys[-2], (32, 32), jnp.float32),
        "sex_embedding": jax.random.normal(keys[-1], (4, 32), jnp.float32),
    }


def fcnet_h_class_forward(params, x, *, max_batch_tile=512, vmem_budget_bytes=24 << 20,
                          return_padded=False):
    """Single fused pallas_call for the whole network (all layers + log_softmax)."""
    B, F = x.shape
    layers = params["layers"]
    num_layers = len(layers)
    o_valid = params["output_channel"]
    o_pad = layers[-1][0].shape[1]

    weight_bytes = sum(w.size * w.dtype.itemsize + b.size * b.dtype.itemsize
                       for (w, b) in layers)

    # VMEM-aware batch tile: resident weights + double-buffered (bt,F) x-tile and
    # (bt,o_pad) out-tile must fit comfortably in the per-generation VMEM budget.
    per_row_bytes = 2 * (F * x.dtype.itemsize + o_pad * 4)
    avail = max(vmem_budget_bytes - 2 * weight_bytes, 1 << 20)
    bt_cap = max(_SUBLANE, min(max_batch_tile, (avail // per_row_bytes) // _SUBLANE * _SUBLANE))

    n_steps = max(1, _cdiv(B, bt_cap))
    if B >= 16:
        n_steps = max(n_steps, 2)  # >=2 'parallel' grid steps so v7x's two TCs both get work
    bt = _round_up(_cdiv(B, n_steps), _SUBLANE)
    b_pad = n_steps * bt
    if b_pad != B:
        # Only the small remainder is padded (no unconditional full concat).
        x = jnp.pad(x, ((0, b_pad - B), (0, 0)))

    flat_wb = []
    flops = 0
    for (w, b) in layers:
        flat_wb.extend([w, b])
        flops += 2 * b_pad * w.shape[0] * w.shape[1]
    bytes_accessed = b_pad * F * x.dtype.itemsize + b_pad * o_pad * 4 + weight_bytes
    transcendentals = b_pad * (o_pad + 1)  # exp per class lane + log per row

    vmem_limit = int(min(64 << 20,
                         max(32 << 20,
                             2 * weight_bytes + 2 * bt * (F * 4 + o_pad * 4) + (4 << 20))))

    def _wb_specs(single_buffer):
        specs = []
        for (w, b) in layers:
            if single_buffer:
                # Grid-invariant blocks: DMA'd once; single-buffer to halve VMEM footprint.
                specs.append(pl.BlockSpec(w.shape, lambda i: (0, 0),
                                          pipeline_mode=pl.Buffered(1)))
                specs.append(pl.BlockSpec(b.shape, lambda i: (0, 0),
                                          pipeline_mode=pl.Buffered(1)))
            else:
                specs.append(pl.BlockSpec(w.shape, lambda i: (0, 0)))
                specs.append(pl.BlockSpec(b.shape, lambda i: (0, 0)))
        return specs

    def _run(single_buffer):
        return pl.pallas_call(
            functools.partial(_fcnet_fused_kernel, num_layers=num_layers),
            out_shape=jax.ShapeDtypeStruct((b_pad, o_pad), jnp.float32),
            grid=(n_steps,),
            in_specs=[pl.BlockSpec((bt, F), lambda i: (i, 0))] + _wb_specs(single_buffer),
            out_specs=pl.BlockSpec((bt, o_pad), lambda i: (i, 0)),
            compiler_params=pltpu.CompilerParams(
                dimension_semantics=("parallel",),
                vmem_limit_bytes=vmem_limit,
            ),
            cost_estimate=pl.CostEstimate(
                flops=flops,
                transcendentals=transcendentals,
                bytes_accessed=bytes_accessed,
            ),
        )(x, *flat_wb)

    try:
        out_padded = _run(single_buffer=True)
    except Exception:
        # Fallback: default double-buffered specs if single-buffer pipeline_mode is
        # unsupported by the installed jax version.
        out_padded = _run(single_buffer=False)

    if return_padded:
        # Consumers that tolerate lane padding can skip the trailing slice copy.
        return out_padded
    return out_padded[:B, :o_valid]


if __name__ == "__main__":
    # Small, module-consistent shapes.
    batch = 8
    feature_channel = 32
    hidden_list = [64, 32]
    output_channel = 16

    key = jax.random.PRNGKey(0)
    k_params, k_x = jax.random.split(key)

    params = init_fcnet_h_class_params(k_params, feature_channel, output_channel, hidden_list)
    x = jax.random.normal(k_x, (batch, feature_channel), jnp.float32)

    out = jax.block_until_ready(fcnet_h_class_forward(params, x))

    # Pure-JAX reference performing the same padded bf16-weight math + log_softmax.
    h = x
    layers = params["layers"]
    for li, (w, b) in enumerate(layers):
        y = jnp.dot(h.astype(w.dtype), w, preferred_element_type=jnp.float32) + b
        h = jnp.maximum(y, 0.0) if li < len(layers) - 1 else y
    ref = jax.nn.log_softmax(h, axis=1)[:, :output_channel]

    assert out.shape == (batch, output_channel), out.shape
    max_err = float(jnp.max(jnp.abs(out - ref)))
    assert jnp.allclose(out, ref, atol=2e-3, rtol=2e-3), max_err

    print("KERNEL_OK")
</pallas_src>

<mosaic_0001>
module attributes {stable_mosaic.version = 11 : i64} {
  func.func @_fcnet_fused_kernel(%arg0: i32, %arg1: memref<8x32xf32, #tpu.memory_space<vmem>>, %arg2: memref<32x128xbf16, #tpu.memory_space<vmem>>, %arg3: memref<1x128xf32, #tpu.memory_space<vmem>>, %arg4: memref<128x128xbf16, #tpu.memory_space<vmem>>, %arg5: memref<1x128xf32, #tpu.memory_space<vmem>>, %arg6: memref<128x128xbf16, #tpu.memory_space<vmem>>, %arg7: memref<1x128xf32, #tpu.memory_space<vmem>>, %arg8: memref<8x128xf32, #tpu.memory_space<vmem>>) attributes {dimension_semantics = [#tpu.dimension_semantics<parallel>], iteration_bounds = array<i64: 1>, scalar_prefetch = 0 : i64, scratch_operands = 0 : i64, tpu.core_type = #tpu.core_type<tc>, window_params = [{transform_indices = @transform_0, window_bounds = array<i64: 8, 32>}, {pipeline_mode = #tpu.pipeline_mode<synchronous>, transform_indices = @transform_1, window_bounds = array<i64: 32, 128>}, {pipeline_mode = #tpu.pipeline_mode<synchronous>, transform_indices = @transform_2, window_bounds = array<i64: 1, 128>}, {pipeline_mode = #tpu.pipeline_mode<synchronous>, transform_indices = @transform_3, window_bounds = array<i64: 128, 128>}, {pipeline_mode = #tpu.pipeline_mode<synchronous>, transform_indices = @transform_4, window_bounds = array<i64: 1, 128>}, {pipeline_mode = #tpu.pipeline_mode<synchronous>, transform_indices = @transform_5, window_bounds = array<i64: 128, 128>}, {pipeline_mode = #tpu.pipeline_mode<synchronous>, transform_indices = @transform_6, window_bounds = array<i64: 1, 128>}, {transform_indices = @transform_7, window_bounds = array<i64: 8, 128>}]} {
    %c0 = arith.constant 0 : index
    %c0_0 = arith.constant 0 : index
    %0 = vector.load %arg1[%c0, %c0_0] : memref<8x32xf32, #tpu.memory_space<vmem>>, vector<8x32xf32>
    %1 = arith.truncf %0 : vector<8x32xf32> to vector<8x32xbf16>
    %c0_1 = arith.constant 0 : index
    %c0_2 = arith.constant 0 : index
    %2 = vector.load %arg2[%c0_1, %c0_2] : memref<32x128xbf16, #tpu.memory_space<vmem>>, vector<32x128xbf16>
    %cst = arith.constant dense<0.000000e+00> : vector<8x128xf32>
    %3 = tpu.matmul %1, %2, %cst {dimension_numbers = #tpu.dot_dimension_numbers<[1], [0], [0], [1], [0, 0, 1, 1], [], []>} : vector<8x32xbf16>, vector<32x128xbf16>, vector<8x128xf32> -> vector<8x128xf32>
    %c0_3 = arith.constant 0 : index
    %c0_4 = arith.constant 0 : index
    %4 = vector.load %arg3[%c0_3, %c0_4] : memref<1x128xf32, #tpu.memory_space<vmem>>, vector<1x128xf32>
    %5 = vector.broadcast %4 : vector<1x128xf32> to vector<8x128xf32>
    %6 = arith.addf %3, %5 : vector<8x128xf32>
    %cst_5 = arith.constant 0.000000e+00 : f32
    %7 = vector.broadcast %cst_5 : f32 to vector<8x128xf32>
    %8 = arith.maximumf %6, %7 : vector<8x128xf32>
    %9 = arith.truncf %8 : vector<8x128xf32> to vector<8x128xbf16>
    %c0_6 = arith.constant 0 : index
    %c0_7 = arith.constant 0 : index
    %10 = vector.load %arg4[%c0_6, %c0_7] : memref<128x128xbf16, #tpu.memory_space<vmem>>, vector<128x128xbf16>
    %cst_8 = arith.constant dense<0.000000e+00> : vector<8x128xf32>
    %11 = tpu.matmul %9, %10, %cst_8 {dimension_numbers = #tpu.dot_dimension_numbers<[1], [0], [0], [1], [0, 0, 1, 1], [], []>} : vector<8x128xbf16>, vector<128x128xbf16>, vector<8x128xf32> -> vector<8x128xf32>
    %c0_9 = arith.constant 0 : index
    %c0_10 = arith.constant 0 : index
    %12 = vector.load %arg5[%c0_9, %c0_10] : memref<1x128xf32, #tpu.memory_space<vmem>>, vector<1x128xf32>
    %13 = vector.broadcast %12 : vector<1x128xf32> to vector<8x128xf32>
    %14 = arith.addf %11, %13 : vector<8x128xf32>
    %cst_11 = arith.constant 0.000000e+00 : f32
    %15 = vector.broadcast %cst_11 : f32 to vector<8x128xf32>
    %16 = arith.maximumf %14, %15 : vector<8x128xf32>
    %17 = arith.truncf %16 : vector<8x128xf32> to vector<8x128xbf16>
    %c0_12 = arith.constant 0 : index
    %c0_13 = arith.constant 0 : index
    %18 = vector.load %arg6[%c0_12, %c0_13] : memref<128x128xbf16, #tpu.memory_space<vmem>>, vector<128x128xbf16>
    %cst_14 = arith.constant dense<0.000000e+00> : vector<8x128xf32>
    %19 = tpu.matmul %17, %18, %cst_14 {dimension_numbers = #tpu.dot_dimension_numbers<[1], [0], [0], [1], [0, 0, 1, 1], [], []>} : vector<8x128xbf16>, vector<128x128xbf16>, vector<8x128xf32> -> vector<8x128xf32>
    %c0_15 = arith.constant 0 : index
    %c0_16 = arith.constant 0 : index
    %20 = vector.load %arg7[%c0_15, %c0_16] : memref<1x128xf32, #tpu.memory_space<vmem>>, vector<1x128xf32>
    %21 = vector.broadcast %20 : vector<1x128xf32> to vector<8x128xf32>
    %22 = arith.addf %19, %21 : vector<8x128xf32>
    %cst_17 = arith.constant dense<0xFF800000> : vector<8xf32>
    %23 = vector.multi_reduction <maximumf>, %22, %cst_17 [1] : vector<8x128xf32> to vector<8xf32>
    %24 = vector.shape_cast %23 : vector<8xf32> to vector<8x1xf32>
    %25 = vector.broadcast %24 : vector<8x1xf32> to vector<8x128xf32>
    %26 = arith.subf %22, %25 : vector<8x128xf32>
    %27 = math.exp %26 : vector<8x128xf32>
    %cst_18 = arith.constant dense<0.000000e+00> : vector<8xf32>
    %28 = vector.multi_reduction <add>, %27, %cst_18 [1] : vector<8x128xf32> to vector<8xf32>
    %29 = vector.shape_cast %28 : vector<8xf32> to vector<8x1xf32>
    %30 = math.log %29 : vector<8x1xf32>
    %31 = vector.broadcast %30 : vector<8x1xf32> to vector<8x128xf32>
    %32 = arith.subf %26, %31 : vector<8x128xf32>
    %c0_19 = arith.constant 0 : index
    %c0_20 = arith.constant 0 : index
    %33 = vector.load %arg8[%c0_19, %c0_20] : memref<8x128xf32, #tpu.memory_space<vmem>>, vector<8x128xf32>
    tpu.vector_store %arg8[%c0_19, %c0_20], %32 {strides = array<i32>} : memref<8x128xf32, #tpu.memory_space<vmem>>, vector<8x128xf32>,
    return
  }
  func.func @transform_0(%arg0: i32) -> (i32, i32) {
    %c0_i32 = arith.constant 0 : i32
    %c0_i32_0 = arith.constant 0 : i32
    return %arg0, %c0_i32 : i32, i32
  }
  func.func @transform_1(%arg0: i32) -> (i32, i32) {
    %c0_i32 = arith.constant 0 : i32
    %c0_i32_0 = arith.constant 0 : i32
    %c0_i32_1 = arith.constant 0 : i32
    return %c0_i32, %c0_i32_0 : i32, i32
  }
  func.func @transform_2(%arg0: i32) -> (i32, i32) {
    %c0_i32 = arith.constant 0 : i32
    %c0_i32_0 = arith.constant 0 : i32
    %c0_i32_1 = arith.constant 0 : i32
    return %c0_i32, %c0_i32_0 : i32, i32
  }
  func.func @transform_3(%arg0: i32) -> (i32, i32) {
    %c0_i32 = arith.constant 0 : i32
    %c0_i32_0 = arith.constant 0 : i32
    %c0_i32_1 = arith.constant 0 : i32
    return %c0_i32, %c0_i32_0 : i32, i32
  }
  func.func @transform_4(%arg0: i32) -> (i32, i32) {
    %c0_i32 = arith.constant 0 : i32
    %c0_i32_0 = arith.constant 0 : i32
    %c0_i32_1 = arith.constant 0 : i32
    return %c0_i32, %c0_i32_0 : i32, i32
  }
  func.func @transform_5(%arg0: i32) -> (i32, i32) {
    %c0_i32 = arith.constant 0 : i32
    %c0_i32_0 = arith.constant 0 : i32
    %c0_i32_1 = arith.constant 0 : i32
    return %c0_i32, %c0_i32_0 : i32, i32
  }
  func.func @transform_6(%arg0: i32) -> (i32, i32) {
    %c0_i32 = arith.constant 0 : i32
    %c0_i32_0 = arith.constant 0 : i32
    %c0_i32_1 = arith.constant 0 : i32
    return %c0_i32, %c0_i32_0 : i32, i32
  }
  func.func @transform_7(%arg0: i32) -> (i32, i32) {
    %c0_i32 = arith.constant 0 : i32
    %c0_i32_0 = arith.constant 0 : i32
    return %arg0, %c0_i32 : i32, i32
  }
}

module attributes {stable_mosaic.version = 11 : i64} {
  func.func @_fcnet_fused_kernel(%arg0: i32, %arg1: memref<8x32xf32, #tpu.memory_space<vmem>>, %arg2: memref<32x128xbf16, #tpu.memory_space<vmem>>, %arg3: memref<1x128xf32, #tpu.memory_space<vmem>>, %arg4: memref<128x128xbf16, #tpu.memory_space<vmem>>, %arg5: memref<1x128xf32, #tpu.memory_space<vmem>>, %arg6: memref<128x128xbf16, #tpu.memory_space<vmem>>, %arg7: memref<1x128xf32, #tpu.memory_space<vmem>>, %arg8: memref<8x128xf32, #tpu.memory_space<vmem>>) attributes {dimension_semantics = [#tpu.dimension_semantics<parallel>], iteration_bounds = array<i64: 1>, scalar_prefetch = 0 : i64, scratch_operands = 0 : i64, tpu.core_type = #tpu.core_type<tc>, window_params = [{transform_indices = @transform_0, window_bounds = array<i64: 8, 32>}, {pipeline_mode = #tpu.pipeline_mode<synchronous>, transform_indices = @transform_1, window_bounds = array<i64: 32, 128>}, {pipeline_mode = #tpu.pipeline_mode<synchronous>, transform_indices = @transform_2, window_bounds = array<i64: 1, 128>}, {pipeline_mode = #tpu.pipeline_mode<synchronous>, transform_indices = @transform_3, window_bounds = array<i64: 128, 128>}, {pipeline_mode = #tpu.pipeline_mode<synchronous>, transform_indices = @transform_4, window_bounds = array<i64: 1, 128>}, {pipeline_mode = #tpu.pipeline_mode<synchronous>, transform_indices = @transform_5, window_bounds = array<i64: 128, 128>}, {pipeline_mode = #tpu.pipeline_mode<synchronous>, transform_indices = @transform_6, window_bounds = array<i64: 1, 128>}, {transform_indices = @transform_7, window_bounds = array<i64: 8, 128>}]} {
    %c0 = arith.constant 0 : index
    %c0_0 = arith.constant 0 : index
    %0 = vector.load %arg1[%c0, %c0_0] : memref<8x32xf32, #tpu.memory_space<vmem>>, vector<8x32xf32>
    %1 = arith.truncf %0 : vector<8x32xf32> to vector<8x32xbf16>
    %c0_1 = arith.constant 0 : index
    %c0_2 = arith.constant 0 : index
    %2 = vector.load %arg2[%c0_1, %c0_2] : memref<32x128xbf16, #tpu.memory_space<vmem>>, vector<32x128xbf16>
    %cst = arith.constant dense<0.000000e+00> : vector<8x128xf32>
    %3 = tpu.matmul %1, %2, %cst {dimension_numbers = #tpu.dot_dimension_numbers<[1], [0], [0], [1], [0, 0, 1, 1], [], []>} : vector<8x32xbf16>, vector<32x128xbf16>, vector<8x128xf32> -> vector<8x128xf32>
    %c0_3 = arith.constant 0 : index
    %c0_4 = arith.constant 0 : index
    %4 = vector.load %arg3[%c0_3, %c0_4] : memref<1x128xf32, #tpu.memory_space<vmem>>, vector<1x128xf32>
    %5 = vector.broadcast %4 : vector<1x128xf32> to vector<8x128xf32>
    %6 = arith.addf %3, %5 : vector<8x128xf32>
    %cst_5 = arith.constant 0.000000e+00 : f32
    %7 = vector.broadcast %cst_5 : f32 to vector<8x128xf32>
    %8 = arith.maximumf %6, %7 : vector<8x128xf32>
    %9 = arith.truncf %8 : vector<8x128xf32> to vector<8x128xbf16>
    %c0_6 = arith.constant 0 : index
    %c0_7 = arith.constant 0 : index
    %10 = vector.load %arg4[%c0_6, %c0_7] : memref<128x128xbf16, #tpu.memory_space<vmem>>, vector<128x128xbf16>
    %cst_8 = arith.constant dense<0.000000e+00> : vector<8x128xf32>
    %11 = tpu.matmul %9, %10, %cst_8 {dimension_numbers = #tpu.dot_dimension_numbers<[1], [0], [0], [1], [0, 0, 1, 1], [], []>} : vector<8x128xbf16>, vector<128x128xbf16>, vector<8x128xf32> -> vector<8x128xf32>
    %c0_9 = arith.constant 0 : index
    %c0_10 = arith.constant 0 : index
    %12 = vector.load %arg5[%c0_9, %c0_10] : memref<1x128xf32, #tpu.memory_space<vmem>>, vector<1x128xf32>
    %13 = vector.broadcast %12 : vector<1x128xf32> to vector<8x128xf32>
    %14 = arith.addf %11, %13 : vector<8x128xf32>
    %cst_11 = arith.constant 0.000000e+00 : f32
    %15 = vector.broadcast %cst_11 : f32 to vector<8x128xf32>
    %16 = arith.maximumf %14, %15 : vector<8x128xf32>
    %17 = arith.truncf %16 : vector<8x128xf32> to vector<8x128xbf16>
    %c0_12 = arith.constant 0 : index
    %c0_13 = arith.constant 0 : index
    %18 = vector.load %arg6[%c0_12, %c0_13] : memref<128x128xbf16, #tpu.memory_space<vmem>>, vector<128x128xbf16>
    %cst_14 = arith.constant dense<0.000000e+00> : vector<8x128xf32>
    %19 = tpu.matmul %17, %18, %cst_14 {dimension_numbers = #tpu.dot_dimension_numbers<[1], [0], [0], [1], [0, 0, 1, 1], [], []>} : vector<8x128xbf16>, vector<128x128xbf16>, vector<8x128xf32> -> vector<8x128xf32>
    %c0_15 = arith.constant 0 : index
    %c0_16 = arith.constant 0 : index
    %20 = vector.load %arg7[%c0_15, %c0_16] : memref<1x128xf32, #tpu.memory_space<vmem>>, vector<1x128xf32>
    %21 = vector.broadcast %20 : vector<1x128xf32> to vector<8x128xf32>
    %22 = arith.addf %19, %21 : vector<8x128xf32>
    %cst_17 = arith.constant dense<0xFF800000> : vector<8xf32>
    %23 = vector.multi_reduction <maximumf>, %22, %cst_17 [1] : vector<8x128xf32> to vector<8xf32>
    %24 = vector.shape_cast %23 : vector<8xf32> to vector<8x1xf32>
    %25 = vector.broadcast %24 : vector<8x1xf32> to vector<8x128xf32>
    %26 = arith.subf %22, %25 : vector<8x128xf32>
    %27 = math.exp %26 : vector<8x128xf32>
    %cst_18 = arith.constant dense<0.000000e+00> : vector<8xf32>
    %28 = vector.multi_reduction <add>, %27, %cst_18 [1] : vector<8x128xf32> to vector<8xf32>
    %29 = vector.shape_cast %28 : vector<8xf32> to vector<8x1xf32>
    %30 = math.log %29 : vector<8x1xf32>
    %31 = vector.broadcast %30 : vector<8x1xf32> to vector<8x128xf32>
    %32 = arith.subf %26, %31 : vector<8x128xf32>
    %c0_19 = arith.constant 0 : index
    %c0_20 = arith.constant 0 : index
    %33 = vector.load %arg8[%c0_19, %c0_20] : memref<8x128xf32, #tpu.memory_space<vmem>>, vector<8x128xf32>
    tpu.vector_store %arg8[%c0_19, %c0_20], %32 {strides = array<i32>} : memref<8x128xf32, #tpu.memory_space<vmem>>, vector<8x128xf32>,
    return
  }
  func.func @transform_0(%arg0: i32) -> (i32, i32) {
    %c0_i32 = arith.constant 0 : i32
    %c0_i32_0 = arith.constant 0 : i32
    return %arg0, %c0_i32 : i32, i32
  }
  func.func @transform_1(%arg0: i32) -> (i32, i32) {
    %c0_i32 = arith.constant 0 : i32
    %c0_i32_0 = arith.constant 0 : i32
    %c0_i32_1 = arith.constant 0 : i32
    return %c0_i32, %c0_i32_0 : i32, i32
  }
  func.func @transform_2(%arg0: i32) -> (i32, i32) {
    %c0_i32 = arith.constant 0 : i32
    %c0_i32_0 = arith.constant 0 : i32
    %c0_i32_1 = arith.constant 0 : i32
    return %c0_i32, %c0_i32_0 : i32, i32
  }
  func.func @transform_3(%arg0: i32) -> (i32, i32) {
    %c0_i32 = arith.constant 0 : i32
    %c0_i32_0 = arith.constant 0 : i32
    %c0_i32_1 = arith.constant 0 : i32
    return %c0_i32, %c0_i32_0 : i32, i32
  }
  func.func @transform_4(%arg0: i32) -> (i32, i32) {
    %c0_i32 = arith.constant 0 : i32
    %c0_i32_0 = arith.constant 0 : i32
    %c0_i32_1 = arith.constant 0 : i32
    return %c0_i32, %c0_i32_0 : i32, i32
  }
  func.func @transform_5(%arg0: i32) -> (i32, i32) {
    %c0_i32 = arith.constant 0 : i32
    %c0_i32_0 = arith.constant 0 : i32
    %c0_i32_1 = arith.constant 0 : i32
    return %c0_i32, %c0_i32_0 : i32, i32
  }
  func.func @transform_6(%arg0: i32) -> (i32, i32) {
    %c0_i32 = arith.constant 0 : i32
    %c0_i32_0 = arith.constant 0 : i32
    %c0_i32_1 = arith.constant 0 : i32
    return %c0_i32, %c0_i32_0 : i32, i32
  }
  func.func @transform_7(%arg0: i32) -> (i32, i32) {
    %c0_i32 = arith.constant 0 : i32
    %c0_i32_0 = arith.constant 0 : i32
    return %arg0, %c0_i32 : i32, i32
  }
}

</mosaic_0001>

<bundles_post_ra>
// kernel: tpu_custom_call.1
= control target key start
LH: loop header
LB: loop body
LE: loop exit
PB: predicated region body
PF: predicated region fallthrough
CT: control target
= control target key end

     0   :  { %12 = vsyncpa [#allocation3], 0  ;;  %s795_s0 = inlined_call_operand.hbm [shape: f32[8,32], index: 0, kind: input, shape index: {}]   ;;  %s796_s1 = inlined_call_operand.hbm [shape: bf16[32,128], index: 1, kind: input, shape index: {}]   ;;  %s797_s2 = inlined_call_operand.vmem [shape: f32[1,128], index: 2, kind: input, shape index: {}]   ;;  %s798_s3 = inlined_call_operand.hbm [shape: bf16[128,128], index: 3, kind: input, shape index: {}]   ;;  %s799_s4 = inlined_call_operand.vmem [shape: f32[1,128], index: 4, kind: input, shape index: {}]   ;;  %s800_s5 = inlined_call_operand.hbm [shape: bf16[128,128], index: 5, kind: input, shape index: {}]   ;;  %s801_s6 = inlined_call_operand.vmem [shape: f32[1,128], index: 6, kind: input, shape index: {}]   ;;  %s802_s7 = inlined_call_operand.hbm [shape: f32[8,128], index: 7, kind: output, shape index: {}]  }
   0x1   :  { %13 = vsyncpa [#allocation6], 0 }
   0x2   :  { %14 = vsyncpa [#allocation9], 0 }
   0x3   :  { %15 = vsyncpa [#allocation4], 0  ;;  %s644_s24 = smov [#allocation5]   ;;  %s526_s28 = scalar_lea.hbm %s796_s1, 256 }
   0x4   :  { %s31_s25 = sshll.u32 %s644_s24, 4  ;;  %p527_p0 = scmp.ne.s32.totalorder %s796_s1, %s526_s28  ;;  %s32_s25 = int_to_ptr.vmem [resolvable:$true] %s31_s25 }
   0x5   :  { %p530_p1 = scmp.lt.u32.totalorder %s526_s28, %s796_s1 }
   0x7   :  { %p532_p2 = pnand %p530_p1, %p527_p0 }
   0x9   :  { %535 = shalt.err (!%p532_p2)
}
   0xa   :  { %s536_s10 = scalar_lea.vmem %s32_s25, 256  ;;  %p541_p4 = scmp.lt.s32.totalorder %s32_s25, %s32_s25 }
   0xb   :  { %p537_p3 = scmp.ne.s32.totalorder %s32_s25, %s536_s10  ;;  %p542_p5 = scmp.lt.s32.totalorder %s536_s10, %s536_s10 }
   0xd   :  { %p543_p6 = por %p542_p5, %p541_p4 }
   0xf   :  { %p544_p7 = pnand %p543_p6, %p537_p3 }
  0x11   :  { %547 = shalt.err (!%p544_p7)
}
  0x12   :  { %s645_s11 = smov 64   ;;  %s646_s12 = smov 4  }
  0x13   :  { %37 = dma.hbm_to_vmem [thread:$0]  %s796_s1, 256, %s32_s25, [#allocation6], %s645_s11, %s645_s11, %s646_s12  }
  0x14   :  { %s647_s15 = smov [#allocation2]   ;;  %s648_s17 = smov [#allocation7]  }
  0x15   :  { %s22_s16 = sshll.u32 %s647_s15, 4  ;;  %s45_s18 = sshll.u32 %s648_s17, 4  ;;  %s23_s16 = int_to_ptr.vmem [resolvable:$true] %s22_s16  ;;  %s46_s18 = int_to_ptr.vmem [resolvable:$true] %s45_s18 }
  0x16   :  { %s548_s21 = scalar_lea.hbm %s795_s0, 128 }
  0x17   :  { %p549_p8 = scmp.ne.s32.totalorder %s795_s0, %s548_s21  ;;  %p552_p9 = scmp.lt.u32.totalorder %s548_s21, %s795_s0 }
  0x19   :  { %p554_p10 = pnand %p552_p9, %p549_p8 }
  0x1b   :  { %557 = shalt.err (!%p554_p10)
}
  0x1c   :  { %s558_s1 = scalar_lea.vmem %s23_s16, 128  ;;  %p563_p12 = scmp.lt.s32.totalorder %s23_s16, %s23_s16 }
  0x1d   :  { %p559_p11 = scmp.ne.s32.totalorder %s23_s16, %s558_s1  ;;  %p564_p13 = scmp.lt.s32.totalorder %s558_s1, %s558_s1 }
  0x1f   :  { %p565_p0 = por %p564_p13, %p563_p12 }
  0x21   :  { %p566_p1 = pnand %p565_p0, %p559_p11 }
  0x23   :  { %569 = shalt.err (!%p566_p1)
}
  0x24   :  { %25 = dma.hbm_to_vmem [thread:$0]  %s795_s0, 128, %s23_s16, [#allocation3]  }
  0x25   :  { %s570_s30 = scalar_lea.hbm %s798_s3, 1024 }
  0x26   :  { %p571_p2 = scmp.ne.s32.totalorder %s798_s3, %s570_s30  ;;  %p574_p3 = scmp.lt.u32.totalorder %s570_s30, %s798_s3 }
  0x28   :  { %p576_p4 = pnand %p574_p3, %p571_p2 }
  0x2a   :  { %579 = shalt.err (!%p576_p4)
}
  0x2b   :  { %s580_s14 = scalar_lea.vmem %s46_s18, 1024  ;;  %p585_p6 = scmp.lt.s32.totalorder %s46_s18, %s46_s18 }
  0x2c   :  { %p581_p5 = scmp.ne.s32.totalorder %s46_s18, %s580_s14  ;;  %p586_p7 = scmp.lt.s32.totalorder %s580_s14, %s580_s14 }
  0x2e   :  { %p587_p8 = por %p586_p7, %p585_p6 }
  0x30   :  { %p588_p9 = pnand %p587_p8, %p581_p5 }
  0x32   :  { %591 = shalt.err (!%p588_p9)
}
  0x33   :  { %51 = dma.hbm_to_vmem [thread:$0]  %s798_s3, 1024, %s46_s18, [#allocation6], %s645_s11, %s645_s11, %s646_s12  }
  0x34   :  { %s649_s16 = smov [#allocation8]   ;;  %s592_s21 = scalar_lea.hbm %s800_s5, 1024 }
  0x35   :  { %s59_s17 = sshll.u32 %s649_s16, 4  ;;  %p593_p10 = scmp.ne.s32.totalorder %s800_s5, %s592_s21  ;;  %s60_s17 = int_to_ptr.vmem [resolvable:$true] %s59_s17 }
  0x36   :  { %p596_p11 = scmp.lt.u32.totalorder %s592_s21, %s800_s5 }
  0x38   :  { %p598_p12 = pnand %p596_p11, %p593_p10 }
  0x3a   :  { %601 = shalt.err (!%p598_p12)
}
  0x3b   :  { %s602_s1 = scalar_lea.vmem %s60_s17, 1024  ;;  %p607_p0 = scmp.lt.s32.totalorder %s60_s17, %s60_s17 }
  0x3c   :  { %p603_p13 = scmp.ne.s32.totalorder %s60_s17, %s602_s1  ;;  %p608_p1 = scmp.lt.s32.totalorder %s602_s1, %s602_s1 }
  0x3e   :  { %p609_p2 = por %p608_p1, %p607_p0 }
  0x40   :  { %p610_p3 = pnand %p609_p2, %p603_p13 }
  0x42   :  { %613 = shalt.err (!%p610_p3)
}
  0x43   :  { %65 = dma.hbm_to_vmem [thread:$0]  %s800_s5, 1024, %s60_s17, [#allocation9], %s645_s11, %s645_s11, %s646_s12  }
  0x44   :  { %636 = dma.done.wait [#allocation3], 128  }
  0x45   :  { %637 = vsyncadd [#allocation3], 4294967168 }
  0x46   :  { %638 = dma.done.wait [#allocation6], 1280  }
  0x47   :  { %639 = vsyncadd [#allocation6], 4294966016 }
  0x48   :  { %640 = dma.done.wait [#allocation9], 1024  }
  0x49   :  { %641 = vsyncadd [#allocation9], 4294966272  ;;  %v650_v0 = vmov 0.0   ;;  %vm651_vm0 = vmmov 0   ;;  %v504_v1 = vld [vmem:[#allocation5] sm:$0xff]   ;;  %v505_v2 = vld [vmem:[#allocation5 + $0x8] sm:$0xff]  }
  0x4a   :  { %447 = vmatprep.subr.bf16.mxu0 %v650_v0  ;;  %451 = vmatprep.mubr.msk.bf16.mxu0 %vm651_vm0, %v650_v0  ;;  %v81_v3 = vld [vmem:[#allocation2] sm:$0xff]  ;;  %v506_v4 = vld [vmem:[#allocation7] sm:$0xff]   ;;  %vm106_vm1 = vcmask 261120   ;;  %v508_v7 = vld [vmem:[#allocation7 + $0x10] sm:$0xff]  }
  0x4b   :  { %455 = vmatprep.subr.bf16.mxu1 %v650_v0  ;;  %471 = vmatprep.mubr.msk.bf16.mxu1 %vm651_vm0, %v650_v0  ;;  %v82_v5 = vpack.c.bf16 %v81_v3, %v81_v3  ;;  %v507_v6 = vld [vmem:[#allocation7 + $0x8] sm:$0xff]   ;;  %v509_v8 = vld [vmem:[#allocation7 + $0x18] sm:$0xff]   ;;  %v510_v9 = vld [vmem:[#allocation7 + $0x20] sm:$0xff]  }
  0x4c   :  { %448 = vmatpush3.bf16.msra.mxu0 %v504_v1  ;;  %456 = vmatpush3.bf16.msra.mxu1 %v506_v4  ;;  %v511_v10 = vld [vmem:[#allocation7 + $0x28] sm:$0xff]   ;;  %v512_v11 = vld [vmem:[#allocation7 + $0x30] sm:$0xff]   ;;  %v513_v12 = vld [vmem:[#allocation7 + $0x38] sm:$0xff]  }
  0x4d   :  { %449 = vmatprep.subr.bf16.mxu0 %v650_v0  ;;  %457 = vmatprep.subr.bf16.mxu1 %v650_v0  ;;  %v514_v13 = vld [vmem:[#allocation8] sm:$0xff]   ;;  %v515_v14 = vld [vmem:[#allocation8 + $0x8] sm:$0xff]   ;;  %v516_v15 = vld [vmem:[#allocation8 + $0x10] sm:$0xff]  }
  0x4e   :  { %v517_v16 = vld [vmem:[#allocation8 + $0x18] sm:$0xff]   ;;  %v518_v17 = vld [vmem:[#allocation8 + $0x20] sm:$0xff]   ;;  %v519_v18 = vld [vmem:[#allocation8 + $0x28] sm:$0xff]  }
  0x4f   :  { %v404_v19 = vld [vmem:[%s797_s2] ss:$0 sm:$0xff]  ;;  %v520_v27 = vld [vmem:[#allocation8 + $0x30] sm:$0xff]   ;;  %v521_v28 = vld [vmem:[#allocation8 + $0x38] sm:$0xff]  }
  0x50   :  { %450 = vmatpush3.bf16.msra.mxu0 %v505_v2  ;;  %458 = vmatpush3.bf16.msra.mxu1 %v507_v6  ;;  %v408_v29 = vld [vmem:[%s799_s4] ss:$0 sm:$0xff]  ;;  %s652_s4 = smov [#allocation10]  }
  0x51   :  { %475 = vmatprep.subr.bf16.mxu0 %v650_v0  ;;  %459 = vmatprep.subr.bf16.mxu1 %v650_v0  ;;  %v417_v37 = vld [vmem:[%s801_s6] ss:$0 sm:$0xff]  ;;  %s393_s28 = sshll.u32 %s652_s4, 4  ;;  %s394_s28 = int_to_ptr.vmem [resolvable:$true] %s393_s28 }
  0x52   :  { %s614_s6 = scalar_lea.vmem %s394_s28, 128  ;;  %p619_p5 = scmp.lt.s32.totalorder %s394_s28, %s394_s28 }
  0x53   :  { %452 = vmatmul.mubr.msk.bf16.vlgmr.msra.gmra.mrb[0].mxu0 %vm106_vm1, %v82_v5  ;;  %p615_p4 = scmp.ne.s32.totalorder %s394_s28, %s614_s6  ;;  %p620_p6 = scmp.lt.s32.totalorder %s614_s6, %s614_s6 }
  0x54   :  { %491 = vmatprep.mubr.msk.bf16.mxu0 %vm651_vm0, %v650_v0  ;;  %460 = vmatpush3.bf16.msra.mxu1 %v508_v7 }
  0x55   :  { %461 = vmatprep.subr.bf16.mxu1 %v650_v0  ;;  %476 = vmatpush3.bf16.msra.mxu0 %v514_v13  ;;  %p621_p7 = por %p620_p6, %p619_p5 }
  0x56   :  { %477 = vmatprep.subr.bf16.mxu0 %v650_v0 }
  0x57   :  { %p622_p8 = pnand %p621_p7, %p615_p4 }
  0x58   :  { %462 = vmatpush3.bf16.msra.mxu1 %v509_v8 }
  0x59   :  { %463 = vmatprep.subr.bf16.mxu1 %v650_v0  ;;  %478 = vmatpush3.bf16.msra.mxu0 %v515_v14 }
  0x5a   :  { %479 = vmatprep.subr.bf16.mxu0 %v650_v0 }
  0x5c   :  { %464 = vmatpush3.bf16.msra.mxu1 %v510_v9 }
  0x5d   :  { %465 = vmatprep.subr.bf16.mxu1 %v650_v0  ;;  %480 = vmatpush3.bf16.msra.mxu0 %v516_v15 }
  0x5e   :  { %481 = vmatprep.subr.bf16.mxu0 %v650_v0 }
  0x60   :  { %466 = vmatpush3.bf16.msra.mxu1 %v511_v10 }
  0x61   :  { %467 = vmatprep.subr.bf16.mxu1 %v650_v0  ;;  %482 = vmatpush3.bf16.msra.mxu0 %v517_v16 }
  0x62   :  { %483 = vmatprep.subr.bf16.mxu0 %v650_v0 }
  0x64   :  { %468 = vmatpush3.bf16.msra.mxu1 %v512_v11 }
  0x65   :  { %469 = vmatprep.subr.bf16.mxu1 %v650_v0  ;;  %484 = vmatpush3.bf16.msra.mxu0 %v518_v17 }
  0x66   :  { %485 = vmatprep.subr.bf16.mxu0 %v650_v0 }
  0x68   :  { %470 = vmatpush3.bf16.msra.mxu1 %v513_v12 }
  0x69   :  { %486 = vmatpush3.bf16.msra.mxu0 %v519_v18 }
  0x6a   :  { %487 = vmatprep.subr.bf16.mxu0 %v650_v0 }
  0x6d   :  { %488 = vmatpush3.bf16.msra.mxu0 %v520_v27 }
  0x6e   :  { %489 = vmatprep.subr.bf16.mxu0 %v650_v0 }
  0x71   :  { %490 = vmatpush3.bf16.msra.mxu0 %v521_v28 }
 0x126   :  { %v144_v20 = vpop.f32.mrb[0].mxu0 }
 0x127   :  { %v145_v21 = vadd.f32 %v404_v19, %v144_v20  ;;  %v453_v22 = vpop.f32.mrb[1].mxu0 }
 0x128   :  { %v147_v23 = vpop.f32.mrb[2].mxu0 }
 0x129   :  { %v150_v24 = vmax.f32 %v145_v21, 0.0  ;;  %v454_v25 = vpop.f32.mrb[3].mxu0 }
 0x12b   :  { %v151_v26 = vpack.c.bf16 %v150_v24, %v150_v24 }
 0x12d   :  { %472 = vmatmul.mubr.bf16.vlgmr.msra.gmra.mrb[0].mxu1 %v151_v26 }
 0x200   :  { %v257_v30 = vpop.f32.mrb[0].mxu1 }
 0x201   :  { %v258_v31 = vadd.f32 %v408_v29, %v257_v30  ;;  %v473_v32 = vpop.f32.mrb[1].mxu1 }
 0x202   :  { %v260_v33 = vpop.f32.mrb[2].mxu1 }
 0x203   :  { %v263_v34 = vmax.f32 %v258_v31, 0.0  ;;  %v474_v35 = vpop.f32.mrb[3].mxu1 }
 0x205   :  { %v264_v36 = vpack.c.bf16 %v263_v34, %v263_v34 }
 0x207   :  { %492 = vmatmul.mubr.bf16.vlgmr.msra.gmra.mrb[4].mxu0 %v264_v36 }
 0x2da   :  { %v370_v38 = vpop.f32.mrb[4].mxu0 }
 0x2db   :  { %v371_v39 = vadd.f32 %v417_v37, %v370_v38  ;;  %v493_v40 = vpop.f32.mrb[5].mxu0 }
 0x2dc   :  { %v373_v41 = vpop.f32.mrb[6].mxu0 }
 0x2dd   :  { %376 = vmax.xlane.f32.xlu0 %v371_v39  ;;  %v494_v42 = vpop.f32.mrb[7].mxu0 }
 0x36a   :  { %v377_v43 = vpop.xlane.xlu0 %376 }
 0x36b   :  { %v378_v44 = vsub.f32 %v371_v39, %v377_v43 }
 0x36d   :  { %v379_v45 = vmul.f32 1.442695, %v378_v44 }
 0x36f   :  { %522 = vpow2.f32 %v379_v45 }
 0x379   :  { %v523_v46 = vpop.eup %522 }
 0x37a   :  { %381 = vadd.xlane.f32.xlu0 %v523_v46 }
 0x407   :  { %v382_v47 = vpop.xlane.xlu0 %381 }
 0x408   :  { %524 = vlog2.f32 %v382_v47 }
 0x412   :  { %v525_v48 = vpop.eup %524 }
 0x413   :  { %v384_v49 = vmul.f32 0.6931472, %v525_v48 }
 0x415   :  { %v385_v50 = vsub.f32 %v378_v44, %v384_v49 }
 0x417   :  { %386 = vst [vmem:[#allocation10] sm:$0xff] %v385_v50 }
 0x418   :  { %625 = shalt.err (!%p622_p8)
}
 0x419   :  { %s626_s8 = scalar_lea.hbm %s802_s7, 128 }
 0x41a   :  { %p627_p9 = scmp.ne.s32.totalorder %s802_s7, %s626_s8  ;;  %p630_p10 = scmp.lt.u32.totalorder %s626_s8, %s802_s7 }
 0x41c   :  { %p632_p11 = pnand %p630_p10, %p627_p9 }
 0x41e   :  { %635 = shalt.err (!%p632_p11)
}
 0x41f   :  { %396 = dma.vmem_to_hbm [thread:$0]  %s394_s28, 128, %s802_s7, [#allocation4]  }
 0x420   :  { %642 = dma.done.wait [#allocation4], 128  }
 0x421   :  { %643 = vsyncadd [#allocation4], 4294967168 }
 0x422   :  { %400 = vsyncpa [#allocation3], 1 }
 0x423   :  { %401 = vsyncpa [#allocation6], 1 }
 0x424   :  { %402 = vsyncpa [#allocation9], 1 }
 0x425   :  { %403 = vsyncpa [#allocation4], 1 }

// kernel: tpu_custom_call.1
= control target key start
LH: loop header
LB: loop body
LE: loop exit
PB: predicated region body
PF: predicated region fallthrough
CT: control target
= control target key end

     0   :  { %12 = vsyncpa [#allocation3], 0  ;;  %s795_s0 = inlined_call_operand.hbm [shape: f32[8,32], index: 0, kind: input, shape index: {}]   ;;  %s796_s1 = inlined_call_operand.hbm [shape: bf16[32,128], index: 1, kind: input, shape index: {}]   ;;  %s797_s2 = inlined_call_operand.vmem [shape: f32[1,128], index: 2, kind: input, shape index: {}]   ;;  %s798_s3 = inlined_call_operand.hbm [shape: bf16[128,128], index: 3, kind: input, shape index: {}]   ;;  %s799_s4 = inlined_call_operand.vmem [shape: f32[1,128], index: 4, kind: input, shape index: {}]   ;;  %s800_s5 = inlined_call_operand.hbm [shape: bf16[128,128], index: 5, kind: input, shape index: {}]   ;;  %s801_s6 = inlined_call_operand.vmem [shape: f32[1,128], index: 6, kind: input, shape index: {}]   ;;  %s802_s7 = inlined_call_operand.hbm [shape: f32[8,128], index: 7, kind: output, shape index: {}]  }
   0x1   :  { %13 = vsyncpa [#allocation6], 0 }
   0x2   :  { %14 = vsyncpa [#allocation9], 0 }
   0x3   :  { %15 = vsyncpa [#allocation4], 0  ;;  %s644_s24 = smov [#allocation5]   ;;  %s526_s28 = scalar_lea.hbm %s796_s1, 256 }
   0x4   :  { %s31_s25 = sshll.u32 %s644_s24, 4  ;;  %p527_p0 = scmp.ne.s32.totalorder %s796_s1, %s526_s28  ;;  %s32_s25 = int_to_ptr.vmem [resolvable:$true] %s31_s25 }
   0x5   :  { %p530_p1 = scmp.lt.u32.totalorder %s526_s28, %s796_s1 }
   0x7   :  { %p532_p2 = pnand %p530_p1, %p527_p0 }
   0x9   :  { %535 = shalt.err (!%p532_p2)
}
   0xa   :  { %s536_s10 = scalar_lea.vmem %s32_s25, 256  ;;  %p541_p4 = scmp.lt.s32.totalorder %s32_s25, %s32_s25 }
   0xb   :  { %p537_p3 = scmp.ne.s32.totalorder %s32_s25, %s536_s10  ;;  %p542_p5 = scmp.lt.s32.totalorder %s536_s10, %s536_s10 }
   0xd   :  { %p543_p6 = por %p542_p5, %p541_p4 }
   0xf   :  { %p544_p7 = pnand %p543_p6, %p537_p3 }
  0x11   :  { %547 = shalt.err (!%p544_p7)
}
  0x12   :  { %s645_s11 = smov 64   ;;  %s646_s12 = smov 4  }
  0x13   :  { %37 = dma.hbm_to_vmem [thread:$0]  %s796_s1, 256, %s32_s25, [#allocation6], %s645_s11, %s645_s11, %s646_s12  }
  0x14   :  { %s647_s15 = smov [#allocation2]   ;;  %s648_s17 = smov [#allocation7]  }
  0x15   :  { %s22_s16 = sshll.u32 %s647_s15, 4  ;;  %s45_s18 = sshll.u32 %s648_s17, 4  ;;  %s23_s16 = int_to_ptr.vmem [resolvable:$true] %s22_s16  ;;  %s46_s18 = int_to_ptr.vmem [resolvable:$true] %s45_s18 }
  0x16   :  { %s548_s21 = scalar_lea.hbm %s795_s0, 128 }
  0x17   :  { %p549_p8 = scmp.ne.s32.totalorder %s795_s0, %s548_s21  ;;  %p552_p9 = scmp.lt.u32.totalorder %s548_s21, %s795_s0 }
  0x19   :  { %p554_p10 = pnand %p552_p9, %p549_p8 }
  0x1b   :  { %557 = shalt.err (!%p554_p10)
}
  0x1c   :  { %s558_s1 = scalar_lea.vmem %s23_s16, 128  ;;  %p563_p12 = scmp.lt.s32.totalorder %s23_s16, %s23_s16 }
  0x1d   :  { %p559_p11 = scmp.ne.s32.totalorder %s23_s16, %s558_s1  ;;  %p564_p13 = scmp.lt.s32.totalorder %s558_s1, %s558_s1 }
  0x1f   :  { %p565_p0 = por %p564_p13, %p563_p12 }
  0x21   :  { %p566_p1 = pnand %p565_p0, %p559_p11 }
  0x23   :  { %569 = shalt.err (!%p566_p1)
}
  0x24   :  { %25 = dma.hbm_to_vmem [thread:$0]  %s795_s0, 128, %s23_s16, [#allocation3]  }
  0x25   :  { %s570_s30 = scalar_lea.hbm %s798_s3, 1024 }
  0x26   :  { %p571_p2 = scmp.ne.s32.totalorder %s798_s3, %s570_s30  ;;  %p574_p3 = scmp.lt.u32.totalorder %s570_s30, %s798_s3 }
  0x28   :  { %p576_p4 = pnand %p574_p3, %p571_p2 }
  0x2a   :  { %579 = shalt.err (!%p576_p4)
}
  0x2b   :  { %s580_s14 = scalar_lea.vmem %s46_s18, 1024  ;;  %p585_p6 = scmp.lt.s32.totalorder %s46_s18, %s46_s18 }
  0x2c   :  { %p581_p5 = scmp.ne.s32.totalorder %s46_s18, %s580_s14  ;;  %p586_p7 = scmp.lt.s32.totalorder %s580_s14, %s580_s14 }
  0x2e   :  { %p587_p8 = por %p586_p7, %p585_p6 }
  0x30   :  { %p588_p9 = pnand %p587_p8, %p581_p5 }
  0x32   :  { %591 = shalt.err (!%p588_p9)
}
  0x33   :  { %51 = dma.hbm_to_vmem [thread:$0]  %s798_s3, 1024, %s46_s18, [#allocation6], %s645_s11, %s645_s11, %s646_s12  }
  0x34   :  { %s649_s16 = smov [#allocation8]   ;;  %s592_s21 = scalar_lea.hbm %s800_s5, 1024 }
  0x35   :  { %s59_s17 = sshll.u32 %s649_s16, 4  ;;  %p593_p10 = scmp.ne.s32.totalorder %s800_s5, %s592_s21  ;;  %s60_s17 = int_to_ptr.vmem [resolvable:$true] %s59_s17 }
  0x36   :  { %p596_p11 = scmp.lt.u32.totalorder %s592_s21, %s800_s5 }
  0x38   :  { %p598_p12 = pnand %p596_p11, %p593_p10 }
  0x3a   :  { %601 = shalt.err (!%p598_p12)
}
  0x3b   :  { %s602_s1 = scalar_lea.vmem %s60_s17, 1024  ;;  %p607_p0 = scmp.lt.s32.totalorder %s60_s17, %s60_s17 }
  0x3c   :  { %p603_p13 = scmp.ne.s32.totalorder %s60_s17, %s602_s1  ;;  %p608_p1 = scmp.lt.s32.totalorder %s602_s1, %s602_s1 }
  0x3e   :  { %p609_p2 = por %p608_p1, %p607_p0 }
  0x40   :  { %p610_p3 = pnand %p609_p2, %p603_p13 }
  0x42   :  { %613 = shalt.err (!%p610_p3)
}
  0x43   :  { %65 = dma.hbm_to_vmem [thread:$0]  %s800_s5, 1024, %s60_s17, [#allocation9], %s645_s11, %s645_s11, %s646_s12  }
  0x44   :  { %636 = dma.done.wait [#allocation3], 128  }
  0x45   :  { %637 = vsyncadd [#allocation3], 4294967168 }
  0x46   :  { %638 = dma.done.wait [#allocation6], 1280  }
  0x47   :  { %639 = vsyncadd [#allocation6], 4294966016 }
  0x48   :  { %640 = dma.done.wait [#allocation9], 1024  }
  0x49   :  { %641 = vsyncadd [#allocation9], 4294966272  ;;  %v650_v0 = vmov 0.0   ;;  %vm651_vm0 = vmmov 0   ;;  %v504_v1 = vld [vmem:[#allocation5] sm:$0xff]   ;;  %v505_v2 = vld [vmem:[#allocation5 + $0x8] sm:$0xff]  }
  0x4a   :  { %447 = vmatprep.subr.bf16.mxu0 %v650_v0  ;;  %451 = vmatprep.mubr.msk.bf16.mxu0 %vm651_vm0, %v650_v0  ;;  %v81_v3 = vld [vmem:[#allocation2] sm:$0xff]  ;;  %v506_v4 = vld [vmem:[#allocation7] sm:$0xff]   ;;  %vm106_vm1 = vcmask 261120   ;;  %v508_v7 = vld [vmem:[#allocation7 + $0x10] sm:$0xff]  }
  0x4b   :  { %455 = vmatprep.subr.bf16.mxu1 %v650_v0  ;;  %471 = vmatprep.mubr.msk.bf16.mxu1 %vm651_vm0, %v650_v0  ;;  %v82_v5 = vpack.c.bf16 %v81_v3, %v81_v3  ;;  %v507_v6 = vld [vmem:[#allocation7 + $0x8] sm:$0xff]   ;;  %v509_v8 = vld [vmem:[#allocation7 + $0x18] sm:$0xff]   ;;  %v510_v9 = vld [vmem:[#allocation7 + $0x20] sm:$0xff]  }
  0x4c   :  { %448 = vmatpush3.bf16.msra.mxu0 %v504_v1  ;;  %456 = vmatpush3.bf16.msra.mxu1 %v506_v4  ;;  %v511_v10 = vld [vmem:[#allocation7 + $0x28] sm:$0xff]   ;;  %v512_v11 = vld [vmem:[#allocation7 + $0x30] sm:$0xff]   ;;  %v513_v12 = vld [vmem:[#allocation7 + $0x38] sm:$0xff]  }
  0x4d   :  { %449 = vmatprep.subr.bf16.mxu0 %v650_v0  ;;  %457 = vmatprep.subr.bf16.mxu1 %v650_v0  ;;  %v514_v13 = vld [vmem:[#allocation8] sm:$0xff]   ;;  %v515_v14 = vld [vmem:[#allocation8 + $0x8] sm:$0xff]   ;;  %v516_v15 = vld [vmem:[#allocation8 + $0x10] sm:$0xff]  }
  0x4e   :  { %v517_v16 = vld [vmem:[#allocation8 + $0x18] sm:$0xff]   ;;  %v518_v17 = vld [vmem:[#allocation8 + $0x20] sm:$0xff]   ;;  %v519_v18 = vld [vmem:[#allocation8 + $0x28] sm:$0xff]  }
  0x4f   :  { %v404_v19 = vld [vmem:[%s797_s2] ss:$0 sm:$0xff]  ;;  %v520_v27 = vld [vmem:[#allocation8 + $0x30] sm:$0xff]   ;;  %v521_v28 = vld [vmem:[#allocation8 + $0x38] sm:$0xff]  }
  0x50   :  { %450 = vmatpush3.bf16.msra.mxu0 %v505_v2  ;;  %458 = vmatpush3.bf16.msra.mxu1 %v507_v6  ;;  %v408_v29 = vld [vmem:[%s799_s4] ss:$0 sm:$0xff]  ;;  %s652_s4 = smov [#allocation10]  }
  0x51   :  { %475 = vmatprep.subr.bf16.mxu0 %v650_v0  ;;  %459 = vmatprep.subr.bf16.mxu1 %v650_v0  ;;  %v417_v37 = vld [vmem:[%s801_s6] ss:$0 sm:$0xff]  ;;  %s393_s28 = sshll.u32 %s652_s4, 4  ;;  %s394_s28 = int_to_ptr.vmem [resolvable:$true] %s393_s28 }
  0x52   :  { %s614_s6 = scalar_lea.vmem %s394_s28, 128  ;;  %p619_p5 = scmp.lt.s32.totalorder %s394_s28, %s394_s28 }
  0x53   :  { %452 = vmatmul.mubr.msk.bf16.vlgmr.msra.gmra.mrb[0].mxu0 %vm106_vm1, %v82_v5  ;;  %p615_p4 = scmp.ne.s32.totalorder %s394_s28, %s614_s6  ;;  %p620_p6 = scmp.lt.s32.totalorder %s614_s6, %s614_s6 }
  0x54   :  { %491 = vmatprep.mubr.msk.bf16.mxu0 %vm651_vm0, %v650_v0  ;;  %460 = vmatpush3.bf16.msra.mxu1 %v508_v7 }
  0x55   :  { %461 = vmatprep.subr.bf16.mxu1 %v650_v0  ;;  %476 = vmatpush3.bf16.msra.mxu0 %v514_v13  ;;  %p621_p7 = por %p620_p6, %p619_p5 }
  0x56   :  { %477 = vmatprep.subr.bf16.mxu0 %v650_v0 }
  0x57   :  { %p622_p8 = pnand %p621_p7, %p615_p4 }
  0x58   :  { %462 = vmatpush3.bf16.msra.mxu1 %v509_v8 }
  0x59   :  { %463 = vmatprep.subr.bf16.mxu1 %v650_v0  ;;  %478 = vmatpush3.bf16.msra.mxu0 %v515_v14 }
  0x5a   :  { %479 = vmatprep.subr.bf16.mxu0 %v650_v0 }
  0x5c   :  { %464 = vmatpush3.bf16.msra.mxu1 %v510_v9 }
  0x5d   :  { %465 = vmatprep.subr.bf16.mxu1 %v650_v0  ;;  %480 = vmatpush3.bf16.msra.mxu0 %v516_v15 }
  0x5e   :  { %481 = vmatprep.subr.bf16.mxu0 %v650_v0 }
  0x60   :  { %466 = vmatpush3.bf16.msra.mxu1 %v511_v10 }
  0x61   :  { %467 = vmatprep.subr.bf16.mxu1 %v650_v0  ;;  %482 = vmatpush3.bf16.msra.mxu0 %v517_v16 }
  0x62   :  { %483 = vmatprep.subr.bf16.mxu0 %v650_v0 }
  0x64   :  { %468 = vmatpush3.bf16.msra.mxu1 %v512_v11 }
  0x65   :  { %469 = vmatprep.subr.bf16.mxu1 %v650_v0  ;;  %484 = vmatpush3.bf16.msra.mxu0 %v518_v17 }
  0x66   :  { %485 = vmatprep.subr.bf16.mxu0 %v650_v0 }
  0x68   :  { %470 = vmatpush3.bf16.msra.mxu1 %v513_v12 }
  0x69   :  { %486 = vmatpush3.bf16.msra.mxu0 %v519_v18 }
  0x6a   :  { %487 = vmatprep.subr.bf16.mxu0 %v650_v0 }
  0x6d   :  { %488 = vmatpush3.bf16.msra.mxu0 %v520_v27 }
  0x6e   :  { %489 = vmatprep.subr.bf16.mxu0 %v650_v0 }
  0x71   :  { %490 = vmatpush3.bf16.msra.mxu0 %v521_v28 }
 0x126   :  { %v144_v20 = vpop.f32.mrb[0].mxu0 }
 0x127   :  { %v145_v21 = vadd.f32 %v404_v19, %v144_v20  ;;  %v453_v22 = vpop.f32.mrb[1].mxu0 }
 0x128   :  { %v147_v23 = vpop.f32.mrb[2].mxu0 }
 0x129   :  { %v150_v24 = vmax.f32 %v145_v21, 0.0  ;;  %v454_v25 = vpop.f32.mrb[3].mxu0 }
 0x12b   :  { %v151_v26 = vpack.c.bf16 %v150_v24, %v150_v24 }
 0x12d   :  { %472 = vmatmul.mubr.bf16.vlgmr.msra.gmra.mrb[0].mxu1 %v151_v26 }
 0x200   :  { %v257_v30 = vpop.f32.mrb[0].mxu1 }
 0x201   :  { %v258_v31 = vadd.f32 %v408_v29, %v257_v30  ;;  %v473_v32 = vpop.f32.mrb[1].mxu1 }
 0x202   :  { %v260_v33 = vpop.f32.mrb[2].mxu1 }
 0x203   :  { %v263_v34 = vmax.f32 %v258_v31, 0.0  ;;  %v474_v35 = vpop.f32.mrb[3].mxu1 }
 0x205   :  { %v264_v36 = vpack.c.bf16 %v263_v34, %v263_v34 }
 0x207   :  { %492 = vmatmul.mubr.bf16.vlgmr.msra.gmra.mrb[4].mxu0 %v264_v36 }
 0x2da   :  { %v370_v38 = vpop.f32.mrb[4].mxu0 }
 0x2db   :  { %v371_v39 = vadd.f32 %v417_v37, %v370_v38  ;;  %v493_v40 = vpop.f32.mrb[5].mxu0 }
 0x2dc   :  { %v373_v41 = vpop.f32.mrb[6].mxu0 }
 0x2dd   :  { %376 = vmax.xlane.f32.xlu0 %v371_v39  ;;  %v494_v42 = vpop.f32.mrb[7].mxu0 }
 0x36a   :  { %v377_v43 = vpop.xlane.xlu0 %376 }
 0x36b   :  { %v378_v44 = vsub.f32 %v371_v39, %v377_v43 }
 0x36d   :  { %v379_v45 = vmul.f32 1.442695, %v378_v44 }
 0x36f   :  { %522 = vpow2.f32 %v379_v45 }
 0x379   :  { %v523_v46 = vpop.eup %522 }
 0x37a   :  { %381 = vadd.xlane.f32.xlu0 %v523_v46 }
 0x407   :  { %v382_v47 = vpop.xlane.xlu0 %381 }
 0x408   :  { %524 = vlog2.f32 %v382_v47 }
 0x412   :  { %v525_v48 = vpop.eup %524 }
 0x413   :  { %v384_v49 = vmul.f32 0.6931472, %v525_v48 }
 0x415   :  { %v385_v50 = vsub.f32 %v378_v44, %v384_v49 }
 0x417   :  { %386 = vst [vmem:[#allocation10] sm:$0xff] %v385_v50 }
 0x418   :  { %625 = shalt.err (!%p622_p8)
}
 0x419   :  { %s626_s8 = scalar_lea.hbm %s802_s7, 128 }
 0x41a   :  { %p627_p9 = scmp.ne.s32.totalorder %s802_s7, %s626_s8  ;;  %p630_p10 = scmp.lt.u32.totalorder %s626_s8, %s802_s7 }
 0x41c   :  { %p632_p11 = pnand %p630_p10, %p627_p9 }
 0x41e   :  { %635 = shalt.err (!%p632_p11)
}
 0x41f   :  { %396 = dma.vmem_to_hbm [thread:$0]  %s394_s28, 128, %s802_s7, [#allocation4]  }
 0x420   :  { %642 = dma.done.wait [#allocation4], 128  }
 0x421   :  { %643 = vsyncadd [#allocation4], 4294967168 }
 0x422   :  { %400 = vsyncpa [#allocation3], 1 }
 0x423   :  { %401 = vsyncpa [#allocation6], 1 }
 0x424   :  { %402 = vsyncpa [#allocation9], 1 }
 0x425   :  { %403 = vsyncpa [#allocation4], 1 }

</bundles_post_ra>
